<compile_context>
chip_gen: v7x
topology: tpu7x:2x2x1
jax: 0.10.0
libtpu: 0.0.40
codegen_flags: <defaults>
</compile_context>

<pallas_src>
import math

import jax
import jax.numpy as jnp
from jax.experimental import pallas as pl
from jax.experimental.pallas import tpu as pltpu


def _round_up(a, b):
    return ((a + b - 1) // b) * b


def _make_kernel(theta, c1, c2, fp):
    """Builds the kernel with scalar coefficients baked in as constants."""

    def kernel(adj_ref, xk_ref, xr_ref, h0_ref, w_ref, o_ref, acc_ref):
        k = pl.program_id(1)

        @pl.when(k == 0)
        def _init():
            acc_ref[...] = jnp.zeros_like(acc_ref)

        # hi_tile += adj[i_tile, k_tile] @ x[k_tile, :]   (MXU, f32 accum)
        acc_ref[...] += jnp.dot(
            adj_ref[...], xk_ref[...], preferred_element_type=jnp.float32
        )

        @pl.when(k == pl.num_programs(1) - 1)
        def _epilogue():
            hi = acc_ref[...]
            h0 = h0_ref[...]
            # support @ W == hi @ W[:F] + h0 @ W[F:]  (avoids the concat)
            sw = jnp.dot(hi, w_ref[:fp, :], preferred_element_type=jnp.float32)
            sw += jnp.dot(h0, w_ref[fp:, :], preferred_element_type=jnp.float32)
            # theta*sw + (1-theta)*((1-alpha)*hi + alpha*h0) + x
            o_ref[...] = theta * sw + c1 * hi + c2 * h0 + xr_ref[...]

    return kernel


def base_module_forward(adj, x, h0, weight, lamda, alpha, l, *, tm=256, tk=1024):
    """Pallas wrapper for the dense-adjacency BaseModule forward.

    adj:(N,N) x:(N,F) h0:(N,F) weight:(2F,F)  ->  (N,F), all float32.
    """
    N, F = x.shape
    assert adj.shape == (N, N)
    assert h0.shape == (N, F)
    assert weight.shape == (2 * F, F)

    # Compile-time scalar coefficients (fold into VPU immediates).
    theta = min(1.0, math.log(lamda / l + 1.0))
    c1 = (1.0 - theta) * (1.0 - alpha)
    c2 = (1.0 - theta) * alpha

    # Tile sizes, clipped for small problems; padded sizes satisfy (8, 128).
    tm = min(tm, _round_up(N, 8))
    tk = min(tk, _round_up(N, 128))
    Fp = _round_up(F, 128)
    Np = _round_up(N, (tm * tk) // math.gcd(tm, tk))

    # Zero-pad to the tiled shapes (zero adj rows/cols leave results exact).
    adj_p = jnp.pad(adj.astype(jnp.float32), ((0, Np - N), (0, Np - N)))
    x_p = jnp.pad(x.astype(jnp.float32), ((0, Np - N), (0, Fp - F)))
    h0_p = jnp.pad(h0.astype(jnp.float32), ((0, Np - N), (0, Fp - F)))
    w1 = jnp.pad(weight[:F].astype(jnp.float32), ((0, Fp - F), (0, Fp - F)))
    w2 = jnp.pad(weight[F:].astype(jnp.float32), ((0, Fp - F), (0, Fp - F)))
    w_p = jnp.concatenate([w1, w2], axis=0)  # (2*Fp, Fp)

    grid = (Np // tm, Np // tk)

    cost = pl.CostEstimate(
        flops=2 * Np * Np * Fp + 2 * Np * (2 * Fp) * Fp,
        transcendentals=0,
        bytes_accessed=4 * (Np * Np + 3 * Np * Fp + 2 * Fp * Fp + Np * Fp),
    )

    out_p = pl.pallas_call(
        _make_kernel(theta, c1, c2, Fp),
        out_shape=jax.ShapeDtypeStruct((Np, Fp), jnp.float32),
        grid_spec=pltpu.PrefetchScalarGridSpec(
            num_scalar_prefetch=0,
            grid=grid,
            in_specs=[
                pl.BlockSpec((tm, tk), lambda i, k: (i, k)),    # adj tile
                pl.BlockSpec((tk, Fp), lambda i, k: (k, 0)),    # x rows for adj@x
                pl.BlockSpec((tm, Fp), lambda i, k: (i, 0)),    # x rows (residual)
                pl.BlockSpec((tm, Fp), lambda i, k: (i, 0)),    # h0 rows
                pl.BlockSpec((2 * Fp, Fp), lambda i, k: (0, 0)),  # weight (resident)
            ],
            out_specs=pl.BlockSpec((tm, Fp), lambda i, k: (i, 0)),
            scratch_shapes=[pltpu.VMEM((tm, Fp), jnp.float32)],   # hi accumulator
        ),
        compiler_params=pltpu.CompilerParams(
            dimension_semantics=("parallel", "arbitrary"),
        ),
        cost_estimate=cost,
    )(adj_p, x_p, x_p, h0_p, w_p)

    return out_p[:N, :F]


def _reference(adj, x, h0, weight, lamda, alpha, l):
    theta = min(1.0, math.log(lamda / l + 1.0))
    hi = adj @ x
    support = jnp.concatenate([hi, h0], axis=1)
    r = (1.0 - alpha) * hi + alpha * h0
    out = theta * (support @ weight) + (1.0 - theta) * r
    return out + x


if __name__ == "__main__":
    # Small shapes consistent with the module: N nodes, F = in_features = out_features
    # (the module's math only type-checks when out_features == in_features).
    N, F = 16, 32
    key = jax.random.PRNGKey(0)
    k_adj, k_x, k_h0, k_w = jax.random.split(key, 4)

    # Dense adjacency (stand-in for the torch.sparse adj), node features, initial h0.
    adj = jax.random.uniform(k_adj, (N, N), dtype=jnp.float32)
    x = jax.random.normal(k_x, (N, F), dtype=jnp.float32)
    h0 = jax.random.normal(k_h0, (N, F), dtype=jnp.float32)

    # Deterministic parameter init, matching reset_parameters: U(-stdv, stdv),
    # stdv = 1/sqrt(out_features), weight shape (2*in_features, out_features).
    stdv = 1.0 / math.sqrt(F)
    weight = jax.random.uniform(
        k_w, (2 * F, F), minval=-stdv, maxval=stdv, dtype=jnp.float32
    )

    lamda, alpha, l = 0.5, 0.1, 1.0

    out = base_module_forward(adj, x, h0, weight, lamda, alpha, l)
    out = jax.block_until_ready(out)

    ref = _reference(adj, x, h0, weight, lamda, alpha, l)
    assert out.shape == (N, F)
    assert jnp.allclose(out, ref, atol=1e-4, rtol=1e-4)

    print("KERNEL_OK")
</pallas_src>

<mosaic_0001>
module attributes {stable_mosaic.version = 11 : i64} {
  func.func @kernel(%arg0: i32, %arg1: i32, %arg2: memref<16x128xf32, #tpu.memory_space<vmem>>, %arg3: memref<128x128xf32, #tpu.memory_space<vmem>>, %arg4: memref<16x128xf32, #tpu.memory_space<vmem>>, %arg5: memref<16x128xf32, #tpu.memory_space<vmem>>, %arg6: memref<256x128xf32, #tpu.memory_space<vmem>>, %arg7: memref<16x128xf32, #tpu.memory_space<vmem>>, %arg8: memref<16x128xf32, #tpu.memory_space<vmem>>) attributes {dimension_semantics = [#tpu.dimension_semantics<parallel>, #tpu.dimension_semantics<arbitrary>], iteration_bounds = array<i64: 8, 1>, scalar_prefetch = 0 : i64, scratch_operands = 1 : i64, tpu.core_type = #tpu.core_type<tc>, window_params = [{transform_indices = @transform_0, window_bounds = array<i64: 16, 128>}, {transform_indices = @transform_1, window_bounds = array<i64: 128, 128>}, {transform_indices = @transform_2, window_bounds = array<i64: 16, 128>}, {transform_indices = @transform_3, window_bounds = array<i64: 16, 128>}, {pipeline_mode = #tpu.pipeline_mode<synchronous>, transform_indices = @transform_4, window_bounds = array<i64: 256, 128>}, {transform_indices = @transform_5, window_bounds = array<i64: 16, 128>}]} {
    %c0_i32 = arith.constant 0 : i32
    %0 = arith.cmpi eq, %arg1, %c0_i32 : i32
    %1 = arith.extui %0 : i1 to i32
    %c0_i32_0 = arith.constant 0 : i32
    %2 = arith.cmpi ne, %1, %c0_i32_0 : i32
    scf.if %2 {
      %cst_10 = arith.constant 0.000000e+00 : f32
      %12 = vector.broadcast %cst_10 : f32 to vector<16x128xf32>
      %c0_11 = arith.constant 0 : index
      %c0_12 = arith.constant 0 : index
      %13 = vector.load %arg8[%c0_11, %c0_12] : memref<16x128xf32, #tpu.memory_space<vmem>>, vector<16x128xf32>
      tpu.vector_store %arg8[%c0_11, %c0_12], %12 {strides = array<i32>} : memref<16x128xf32, #tpu.memory_space<vmem>>, vector<16x128xf32>,
    } else {
    }
    %c0 = arith.constant 0 : index
    %c0_1 = arith.constant 0 : index
    %3 = vector.load %arg8[%c0, %c0_1] : memref<16x128xf32, #tpu.memory_space<vmem>>, vector<16x128xf32>
    %c0_2 = arith.constant 0 : index
    %c0_3 = arith.constant 0 : index
    %4 = vector.load %arg2[%c0_2, %c0_3] : memref<16x128xf32, #tpu.memory_space<vmem>>, vector<16x128xf32>
    %c0_4 = arith.constant 0 : index
    %c0_5 = arith.constant 0 : index
    %5 = vector.load %arg3[%c0_4, %c0_5] : memref<128x128xf32, #tpu.memory_space<vmem>>, vector<128x128xf32>
    %cst = arith.constant dense<0.000000e+00> : vector<16x128xf32>
    %6 = tpu.matmul %4, %5, %cst {dimension_numbers = #tpu.dot_dimension_numbers<[1], [0], [0], [1], [0, 0, 1, 1], [], []>} : vector<16x128xf32>, vector<128x128xf32>, vector<16x128xf32> -> vector<16x128xf32>
    %7 = arith.addf %3, %6 : vector<16x128xf32>
    %c0_6 = arith.constant 0 : index
    %c0_7 = arith.constant 0 : index
    %8 = vector.load %arg8[%c0_6, %c0_7] : memref<16x128xf32, #tpu.memory_space<vmem>>, vector<16x128xf32>
    tpu.vector_store %arg8[%c0_6, %c0_7], %7 {strides = array<i32>} : memref<16x128xf32, #tpu.memory_space<vmem>>, vector<16x128xf32>,
    %c0_i32_8 = arith.constant 0 : i32
    %9 = arith.cmpi eq, %arg1, %c0_i32_8 : i32
    %10 = arith.extui %9 : i1 to i32
    %c0_i32_9 = arith.constant 0 : i32
    %11 = arith.cmpi ne, %10, %c0_i32_9 : i32
    scf.if %11 {
      %c0_10 = arith.constant 0 : index
      %c0_11 = arith.constant 0 : index
      %12 = vector.load %arg8[%c0_10, %c0_11] : memref<16x128xf32, #tpu.memory_space<vmem>>, vector<16x128xf32>
      %c0_12 = arith.constant 0 : index
      %c0_13 = arith.constant 0 : index
      %13 = vector.load %arg5[%c0_12, %c0_13] : memref<16x128xf32, #tpu.memory_space<vmem>>, vector<16x128xf32>
      %c0_14 = arith.constant 0 : index
      %c0_15 = arith.constant 0 : index
      %14 = vector.load %arg6[%c0_14, %c0_15] : memref<256x128xf32, #tpu.memory_space<vmem>>, vector<128x128xf32>
      %cst_16 = arith.constant dense<0.000000e+00> : vector<16x128xf32>
      %15 = tpu.matmul %12, %14, %cst_16 {dimension_numbers = #tpu.dot_dimension_numbers<[1], [0], [0], [1], [0, 0, 1, 1], [], []>} : vector<16x128xf32>, vector<128x128xf32>, vector<16x128xf32> -> vector<16x128xf32>
      %c128 = arith.constant 128 : index
      %c0_17 = arith.constant 0 : index
      %16 = vector.load %arg6[%c128, %c0_17] : memref<256x128xf32, #tpu.memory_space<vmem>>, vector<128x128xf32>
      %cst_18 = arith.constant dense<0.000000e+00> : vector<16x128xf32>
      %17 = tpu.matmul %13, %16, %cst_18 {dimension_numbers = #tpu.dot_dimension_numbers<[1], [0], [0], [1], [0, 0, 1, 1], [], []>} : vector<16x128xf32>, vector<128x128xf32>, vector<16x128xf32> -> vector<16x128xf32>
      %18 = arith.addf %15, %17 : vector<16x128xf32>
      %cst_19 = arith.constant 0.405465096 : f32
      %19 = vector.broadcast %cst_19 : f32 to vector<16x128xf32>
      %20 = arith.mulf %19, %18 : vector<16x128xf32>
      %cst_20 = arith.constant 0.535081387 : f32
      %21 = vector.broadcast %cst_20 : f32 to vector<16x128xf32>
      %22 = arith.mulf %21, %12 : vector<16x128xf32>
      %23 = arith.addf %20, %22 : vector<16x128xf32>
      %cst_21 = arith.constant 0.0594534874 : f32
      %24 = vector.broadcast %cst_21 : f32 to vector<16x128xf32>
      %25 = arith.mulf %24, %13 : vector<16x128xf32>
      %26 = arith.addf %23, %25 : vector<16x128xf32>
      %c0_22 = arith.constant 0 : index
      %c0_23 = arith.constant 0 : index
      %27 = vector.load %arg4[%c0_22, %c0_23] : memref<16x128xf32, #tpu.memory_space<vmem>>, vector<16x128xf32>
      %28 = arith.addf %26, %27 : vector<16x128xf32>
      %c0_24 = arith.constant 0 : index
      %c0_25 = arith.constant 0 : index
      %29 = vector.load %arg7[%c0_24, %c0_25] : memref<16x128xf32, #tpu.memory_space<vmem>>, vector<16x128xf32>
      tpu.vector_store %arg7[%c0_24, %c0_25], %28 {strides = array<i32>} : memref<16x128xf32, #tpu.memory_space<vmem>>, vector<16x128xf32>,
    } else {
    }
    return
  }
  func.func @transform_0(%arg0: i32, %arg1: i32) -> (i32, i32) {
    %c0_i32 = arith.constant 0 : i32
    return %arg0, %arg1 : i32, i32
  }
  func.func @transform_1(%arg0: i32, %arg1: i32) -> (i32, i32) {
    %c0_i32 = arith.constant 0 : i32
    %c0_i32_0 = arith.constant 0 : i32
    return %arg1, %c0_i32 : i32, i32
  }
  func.func @transform_2(%arg0: i32, %arg1: i32) -> (i32, i32) {
    %c0_i32 = arith.constant 0 : i32
    %c0_i32_0 = arith.constant 0 : i32
    return %arg0, %c0_i32 : i32, i32
  }
  func.func @transform_3(%arg0: i32, %arg1: i32) -> (i32, i32) {
    %c0_i32 = arith.constant 0 : i32
    %c0_i32_0 = arith.constant 0 : i32
    return %arg0, %c0_i32 : i32, i32
  }
  func.func @transform_4(%arg0: i32, %arg1: i32) -> (i32, i32) {
    %c0_i32 = arith.constant 0 : i32
    %c0_i32_0 = arith.constant 0 : i32
    %c0_i32_1 = arith.constant 0 : i32
    return %c0_i32, %c0_i32_0 : i32, i32
  }
  func.func @transform_5(%arg0: i32, %arg1: i32) -> (i32, i32) {
    %c0_i32 = arith.constant 0 : i32
    %c0_i32_0 = arith.constant 0 : i32
    return %arg0, %c0_i32 : i32, i32
  }
}

</mosaic_0001>

<bundles_post_ra>
// kernel: tpu_custom_call.1
= control target key start
LH: loop header
LB: loop body
LE: loop exit
PB: predicated region body
PF: predicated region fallthrough
CT: control target
= control target key end

     0   :  { %s1876_s0 = inlined_call_operand.hbm [shape: f32[128,128], index: 0, kind: input, shape index: {}]   ;;  %s1877_s1 = inlined_call_operand.hbm [shape: f32[128,128], index: 1, kind: input, shape index: {}]   ;;  %s1878_s2 = inlined_call_operand.hbm [shape: f32[128,128], index: 2, kind: input, shape index: {}]   ;;  %s1879_s3 = inlined_call_operand.hbm [shape: f32[128,128], index: 3, kind: input, shape index: {}]   ;;  %s1880_s4 = inlined_call_operand.hbm [shape: f32[256,128], index: 4, kind: input, shape index: {}]   ;;  %s1881_s5 = inlined_call_operand.hbm [shape: f32[128,128], index: 5, kind: output, shape index: {}]  }
   0x1   :  { %1900 = sst [smem:[#allocation23_spill]] %s1876_s0 }
   0x2   :  { %1901 = sst [smem:[#allocation24_spill]] %s1878_s2 }
   0x3   :  { %10 = vsyncpa [#allocation4], 0 }
   0x4   :  { %12 = vsyncpa [#allocation4 + $0x1], 0 }
   0x5   :  { %13 = vsyncpa [#allocation7], 0 }
   0x6   :  { %14 = vsyncpa [#allocation5], 0 }
   0x7   :  { %16 = vsyncpa [#allocation5 + $0x1], 0  ;;  %s1509_s18 = smov 0   ;;  %s1511_s19 = smov 0  }
   0x8   :  { %s1513_s20 = smov 0   ;;  %s1515_s21 = smov 0  }
   0x9   :  { %s1517_s22 = smov 0   ;;  %s1519_s23 = smov 0  }
   0xa LB: > { %1902 = sst [smem:[#allocation17_spill]] %s1447_s18  ;;  %s34_s24 = sadd.s32 1, %s1463_s22  ;;  %s1467_s23 = sphi %s1519_s23, %s22_s23   ;;  %s1463_s22 = sphi %s1517_s22, %s1937_s22   ;;  %s1459_s21 = sphi %s1515_s21, %s1936_s21   ;;  %s1455_s20 = sphi %s1513_s20, %s1935_s20   ;;  %s1451_s19 = sphi %s1511_s19, %s1939_s19   ;;  %s1447_s18 = sphi %s1509_s18, %s1938_s18  }
   0xb   : > { %1903 = sst [smem:[#allocation18_spill]] %s1455_s20  ;;  %s43_s25 = sadd.s32 1, %s1455_s20 }
   0xc   : > { %1904 = sst [smem:[#allocation19_spill]] %s1463_s22  ;;  %p36_p0 = scmp.ge.s32.totalorder %s34_s24, 8 }
   0xd   : > { %p1882_p1 = scmp.ne.s32.totalorder %s1455_s20, %s1451_s19  ;;  %p51_p2 = scmp.eq.s32.totalorder %s1467_s23, 0 }
   0xe   : > { %s1941_s24 = smov (%p36_p0, %s34_s24), 0  ;;  %p1169_p5 = scmp.lt.s32.totalorder %s1467_s23, 8 }
   0xf   : > { %1905 = sst [smem:[#allocation20_spill]] %s1941_s24  ;;  %p1549_p3 = por %p51_p2, %p1882_p1 }
  0x10   : > { %s38_s27 = ssub.s32 %s1463_s22, %s1941_s24  ;;  %s234_s28 = sand.u32 1, %s1467_s23  }
  0x11   : > { %p41_p4 = scmp.eq.s32.totalorder %s38_s27, 0  ;;  %s236_s29 = sand.u32 1, %s1455_s20  }
  0x12   : > { %s1561_s6 = sshll.u32 %s236_s29, 4  ;;  %s1564_s7 = sshll.u32 %s1463_s22, 8 }
  0x13   : > { %s1559_s30 = scalar_select %p41_p4, %s1455_s20, %s43_s25  }
  0x14   : > { %s1908_s0 = sld [smem:[#allocation23_spill]]  ;;  %s238_s11 = scalar_lea.vmem [#allocation3], %s1561_s6 }
  0x15   : > { %1907 = sst [smem:[#allocation21_spill]] %s1559_s30  ;;  %s246_s12 = sshll.u32 %s238_s11, 4  ;;  %s1573_s12 = int_to_ptr.vmem [resolvable:$true] %s246_s12 }
  0x16   : > { %p1577_p6 = pnand %p1169_p5, %p1549_p3  ;;  %s1581_s14 = scalar_lea.sflag [#allocation4], %s234_s28 }
  0x18   : > { %s1909_s13 = scalar_select %p1577_p6, 1, 0 }
  0x19   : > { %p1587_p8 = pneg %p1577_p6 }
  0x1a   : > { %s1570_s10 = scalar_lea.hbm %s1908_s0, %s1564_s7  ;;  %s1232_s26 = scalar_lea.hbm %s1908_s0, 2048 }
  0x1b   : > { %s1227_s15 = scalar_lea.hbm %s1570_s10, 256  ;;  %p1233_p11 = scmp.lt.u32.totalorder %s1570_s10, %s1908_s0 }
  0x1c   : > { %p1228_p7 = scmp.ne.s32.totalorder %s1570_s10, %s1227_s15  ;;  %p1234_p12 = scmp.lt.u32.totalorder %s1232_s26, %s1227_s15 }
  0x1d   : > { %s1910_s16 = scalar_select %p1587_p8, 1, 0 }
  0x1e   : > { %p1230_p9 = pnand %p1587_p8, %p1228_p7  ;;  %p1235_p13 = por %p1234_p12, %p1233_p11 }
  0x1f   : > { %p1236_p0 = scmp.lt.u32.totalorder %s1227_s15, %s1570_s10 }
  0x20   : > { %p1231_p10 = pneg %p1230_p9 }
  0x21   : > { %p1237_p2 = por %p1236_p0, %p1235_p13 }
  0x23   : > { %p1238_p3 = pnand %p1237_p2, %p1231_p10 }
  0x25   : > { %1241 = shalt.err (!%p1238_p3)
}
  0x26   : > { %s1242_s28 = scalar_lea.vmem %s1573_s12, 256  ;;  %s1469_s8 = smov [#allocation3]  }
  0x27   : > { %p1243_p4 = scmp.ne.s32.totalorder %s1573_s12, %s1242_s28  ;;  %s1247_s9 = sshll.u32 %s1469_s8, 4  ;;  %s1248_s9 = int_to_ptr.vmem [resolvable:$false] %s1247_s9 }
  0x28   : > { %s1249_s11 = scalar_lea.vmem %s1248_s9, 512  ;;  %p1250_p9 = scmp.lt.s32.totalorder %s1573_s12, %s1248_s9 }
  0x29   : > { %p1245_p5 = pnand %p1243_p4, %p1587_p8  ;;  %p1251_p1 = scmp.lt.s32.totalorder %s1249_s11, %s1242_s28 }
  0x2b   : > { %p1246_p7 = pneg %p1245_p5  ;;  %p1252_p11 = por %p1251_p1, %p1250_p9 }
  0x2d   : > { %p1253_p12 = pnand %p1252_p11, %p1246_p7 }
  0x2f   : > { %1256 = shalt.err (!%p1253_p12)
}
  0x30   : > { %s1883_s15 = smov 128   ;;  %s1885_s17 = smov 8  }
  0x31   : > { %1156 = dma.hbm_to_vmem [thread:$0]  (!%p1577_p6), %s1570_s10, 256, %s1573_s12, %s1581_s14, %s1883_s15, %s1883_s15, %s1885_s17  }
  0x32   : > { %s1615_s25 = sadd.s32 4294967295, %s1467_s23   ;;  %s843_s26 = sadd.s32 4294967294, %s1467_s23  }
  0x33   : > { %p56_p1 = scmp.ne.s32.totalorder %s1451_s19, %s1447_s18  ;;  %p1889_p10 = scmp.eq.s32.totalorder %s1615_s25, 0 }
  0x34   : > { %p179_p13 = scmp.eq.s32.totalorder %s1615_s25, 7  ;;  %p185_p0 = scmp.eq.s32.totalorder %s843_s26, 7 }
  0x35   : > { %p844_p2 = scmp.ge.s32.totalorder %s1467_s23, 1  ;;  %p1625_p3 = por %p1889_p10, %p56_p1 }
  0x36   : > { %p1912_p4 = scmp.ne.s32.totalorder %s1455_s20, %s1451_s19  ;;  %p1636_p7 = por %p185_p0, %p56_p1 }
  0x37   : > { %s1911_s27 = scalar_select %p1625_p3, 1, 0 }
  0x38   : > { %p1632_p5 = por %p179_p13, %p1912_p4  ;;  %p192_p9 = scmp.lt.s32.totalorder %s1467_s23, 9 }
  0x39   : > { %s1914_s12 = scalar_select %p1636_p7, 1, 0 }
  0x3a   : > { %s1913_s10 = scalar_select %p1632_p5, 1, 0 }
  0x3b   : > { %1915 = sst [smem:[#allocation22_spill]] %s1914_s12  ;;  %p1641_p11 = pnand %p844_p2, %p192_p9 }
  0x3c   : > { %s1472_s28 = smov [#allocation6]   ;;  %s1917_s2 = sld [smem:[#allocation24_spill]] }
  0x3d   : > { %s1916_s29 = scalar_select %p1641_p11, 1, 0 }
  0x3e   : > { %s207_s8 = sshll.u32 %s1472_s28, 4  ;;  %p1146_p12 = pneg %p1641_p11  ;;  %s1645_s8 = int_to_ptr.vmem [resolvable:$true] %s207_s8 }
  0x3f   : > { %s260_s15 = scalar_lea.vmem [#allocation8], %s1561_s6 }
  0x40   : > { %s267_s17 = sshll.u32 %s260_s15, 4  ;;  %p1658_p1 = pnand %p1146_p12, %p1889_p10  ;;  %s1662_s17 = int_to_ptr.vmem [resolvable:$true] %s267_s17 }
  0x42   : > { %s1653_s26 = scalar_lea.hbm %s1917_s2, %s1564_s7  ;;  %s1262_s24 = scalar_lea.hbm %s1917_s2, 2048 }
  0x43   : > { %s1918_s0 = scalar_select %p1658_p1, 1, 0 }
  0x44   : > { %s1257_s28 = scalar_lea.hbm %s1653_s26, 256  ;;  %p1263_p4 = scmp.lt.u32.totalorder %s1653_s26, %s1917_s2 }
  0x45   : > { %p1258_p13 = scmp.ne.s32.totalorder %s1653_s26, %s1257_s28  ;;  %p1264_p9 = scmp.lt.u32.totalorder %s1262_s24, %s1257_s28 }
  0x46   : > { %p1266_p10 = scmp.lt.u32.totalorder %s1257_s28, %s1653_s26 }
  0x47   : > { %p1260_p0 = pnand %p1258_p13, %p1587_p8  ;;  %p1265_p12 = por %p1264_p9, %p1263_p4 }
  0x49   : > { %p1261_p2 = pneg %p1260_p0  ;;  %p1267_p7 = por %p1266_p10, %p1265_p12 }
  0x4b   : > { %p1268_p5 = pnand %p1267_p7, %p1261_p2 }
  0x4d   : > { %1271 = shalt.err (!%p1268_p5)
}
  0x4e   : > { %s1272_s15 = scalar_lea.vmem %s1662_s17, 256  ;;  %s1473_s9 = smov [#allocation8]  }
  0x4f   : > { %p1273_p13 = scmp.ne.s32.totalorder %s1662_s17, %s1272_s15  ;;  %s1277_s11 = sshll.u32 %s1473_s9, 4  ;;  %s1278_s11 = int_to_ptr.vmem [resolvable:$false] %s1277_s11 }
  0x50   : > { %s1279_s22 = scalar_lea.vmem %s1278_s11, 512  ;;  %p1280_p11 = scmp.lt.s32.totalorder %s1662_s17, %s1278_s11 }
  0x51   : > { %p1275_p0 = pnand %p1273_p13, %p1587_p8  ;;  %p1281_p1 = scmp.lt.s32.totalorder %s1279_s22, %s1272_s15 }
  0x53   : > { %p1276_p3 = pneg %p1275_p0  ;;  %p1282_p4 = por %p1281_p1, %p1280_p11 }
  0x55   : > { %p1283_p9 = pnand %p1282_p4, %p1276_p3 }
  0x57   : > { %1286 = shalt.err (!%p1283_p9)
}
  0x58   : > { %s1919_s24 = smov 8   ;;  %s1920_s30 = smov 128  }
  0x59   : > { %1159 = dma.hbm_to_vmem [thread:$0]  (!%p1577_p6), %s1653_s26, 256, %s1662_s17, %s1581_s14, %s1920_s30, %s1920_s30, %s1919_s24  }
  0x5a   : > { %s1474_s28 = smov [#allocation10]   ;;  %s1287_s15 = scalar_lea.hbm %s1877_s1, 2048 }
  0x5b   : > { %s220_s9 = sshll.u32 %s1474_s28, 4  ;;  %p1288_p10 = scmp.ne.s32.totalorder %s1877_s1, %s1287_s15  ;;  %s221_s9 = int_to_ptr.vmem [resolvable:$true] %s220_s9 }
  0x5c   : > { %p1921_p3 = scmp.ne.s32.totalorder %s1918_s0, 0  ;;  %p1294_p1 = scmp.lt.u32.totalorder %s1287_s15, %s1877_s1 }
  0x5e   : > { %p1289_p5 = pneg %p1921_p3 }
  0x60   : > { %p1290_p7 = pnand %p1289_p5, %p1288_p10 }
  0x62   : > { %p1291_p11 = pneg %p1290_p7 }
  0x64   : > { %p1296_p2 = pnand %p1294_p1, %p1291_p11 }
  0x66   : > { %1299 = shalt.err (!%p1296_p2)
}
  0x67   : > { %s1300_s2 = scalar_lea.vmem %s1645_s8, 2048  ;;  %p1308_p4 = scmp.lt.s32.totalorder %s1645_s8, %s1645_s8 }
  0x68   : > { %p1301_p12 = scmp.ne.s32.totalorder %s1645_s8, %s1300_s2  ;;  %p1309_p9 = scmp.lt.s32.totalorder %s1300_s2, %s1300_s2 }
  0x6a   : > { %p1303_p13 = pnand %p1301_p12, %p1289_p5  ;;  %p1310_p10 = por %p1309_p9, %p1308_p4 }
  0x6c   : > { %p1304_p0 = pneg %p1303_p13 }
  0x6e   : > { %p1311_p7 = pnand %p1310_p10, %p1304_p0 }
  0x70   : > { %1314 = shalt.err (!%p1311_p7)
}
  0x71   : > { %1149 = dma.hbm_to_vmem [thread:$0]  (!%p1921_p3), %s1877_s1, 2048, %s1645_s8, [#allocation7], %s1920_s30, %s1920_s30, %s1919_s24  }
  0x72   : > { %s1315_s26 = scalar_lea.hbm %s1880_s4, 4096 }
  0x73   : > { %p1316_p11 = scmp.ne.s32.totalorder %s1880_s4, %s1315_s26  ;;  %p1322_p12 = scmp.lt.u32.totalorder %s1315_s26, %s1880_s4 }
  0x75   : > { %p1318_p1 = pnand %p1316_p11, %p1289_p5 }
  0x77   : > { %p1319_p2 = pneg %p1318_p1 }
  0x79   : > { %p1324_p13 = pnand %p1322_p12, %p1319_p2 }
  0x7b   : > { %1327 = shalt.err (!%p1324_p13)
}
  0x7c   : > { %s1328_s8 = scalar_lea.vmem %s221_s9, 4096  ;;  %p1336_p10 = scmp.lt.s32.totalorder %s221_s9, %s221_s9 }
  0x7d   : > { %p1329_p0 = scmp.ne.s32.totalorder %s221_s9, %s1328_s8  ;;  %p1337_p7 = scmp.lt.s32.totalorder %s1328_s8, %s1328_s8 }
  0x7f   : > { %p1331_p4 = pnand %p1329_p0, %p1289_p5  ;;  %p1338_p6 = por %p1337_p7, %p1336_p10 }
  0x81   : > { %p1332_p9 = pneg %p1331_p4 }
  0x83   : > { %p1339_p8 = pnand %p1338_p6, %p1332_p9 }
  0x85   : > { %1342 = shalt.err (!%p1339_p8)
}
  0x86   : > { %1152 = dma.hbm_to_vmem [thread:$0]  (!%p1921_p3), %s1880_s4, 4096, %s221_s9, [#allocation7], %s1920_s30, %s1920_s30, %s1919_s24  }
  0x87   : > { %s1746_s12 = scalar_lea.hbm %s1879_s3, %s1564_s7  ;;  %s281_s0 = scalar_lea.vmem [#allocation9], %s1561_s6 }
  0x88   : > { %s288_s26 = sshll.u32 %s281_s0, 4  ;;  %s1343_s28 = scalar_lea.hbm %s1746_s12, 256  ;;  %s1749_s26 = int_to_ptr.vmem [resolvable:$true] %s288_s26 }
  0x89   : > { %p1344_p6 = scmp.ne.s32.totalorder %s1746_s12, %s1343_s28  ;;  %p1922_p8 = scmp.ne.s32.totalorder %s1910_s16, 0 }
  0x8a   : > { %s1348_s11 = scalar_lea.hbm %s1879_s3, 2048  ;;  %p1349_p3 = scmp.lt.u32.totalorder %s1746_s12, %s1879_s3 }
  0x8b   : > { %p1346_p5 = pnand %p1344_p6, %p1922_p8  ;;  %p1350_p1 = scmp.lt.u32.totalorder %s1348_s11, %s1343_s28 }
  0x8c   : > { %p1352_p12 = scmp.lt.u32.totalorder %s1343_s28, %s1746_s12 }
  0x8d   : > { %p1347_p11 = pneg %p1346_p5  ;;  %p1351_p2 = por %p1350_p1, %p1349_p3 }
  0x8f   : > { %p1353_p13 = por %p1352_p12, %p1351_p2 }
  0x91   : > { %p1354_p0 = pnand %p1353_p13, %p1347_p11 }
  0x93   : > { %1357 = shalt.err (!%p1354_p0)
}
  0x94   : > { %s1358_s6 = scalar_lea.vmem %s1749_s26, 256  ;;  %s1475_s8 = smov [#allocation9]  }
  0x95   : > { %p1359_p4 = scmp.ne.s32.totalorder %s1749_s26, %s1358_s6  ;;  %s1363_s2 = sshll.u32 %s1475_s8, 4  ;;  %s1364_s2 = int_to_ptr.vmem [resolvable:$false] %s1363_s2 }
  0x96   : > { %s1365_s18 = scalar_lea.vmem %s1364_s2, 512  ;;  %p1366_p7 = scmp.lt.s32.totalorder %s1749_s26, %s1364_s2 }
  0x97   : > { %p1361_p9 = pnand %p1359_p4, %p1922_p8  ;;  %p1367_p6 = scmp.lt.s32.totalorder %s1365_s18, %s1358_s6 }
  0x99   : > { %p1362_p10 = pneg %p1361_p9  ;;  %p1368_p5 = por %p1367_p6, %p1366_p7 }
  0x9b   : > { %p1369_p3 = pnand %p1368_p5, %p1362_p10 }
  0x9d   : > { %1372 = shalt.err (!%p1369_p3)
}
  0x9e   : > { %p1923_p11 = scmp.ne.s32.totalorder %s1909_s13, 0  ;;  %p1924_p8 = scmp.ne.s32.totalorder %s1916_s29, 0 }
  0x9f   : > { %s302_s16 = sand.u32 (!%p1924_p8), 1, %s1615_s25   ;;  %s304_s20 = sand.u32 (!%p1924_p8), 1, %s1451_s19  }
  0xa0   : > { %1162 = dma.hbm_to_vmem [thread:$0]  (!%p1923_p11), %s1746_s12, 256, %s1749_s26, %s1581_s14, %s1920_s30, %s1920_s30, %s1919_s24  }
  0xa1   : > { %300 = sbr.rel (%p1924_p8) target bundleno = 663 (0x297), region = 40  ;;  %s1782_s17 = sshll.u32 (!%p1924_p8), %s304_s20, 4 }
  0xa2   : > { %s303_s13 = scalar_lea.sflag (!%p1924_p8), [#allocation4], %s302_s16  ;;  %s306_s0 = scalar_lea.vmem (!%p1924_p8), [#allocation3], %s1782_s17 }
  0xa3   : > { %p1925_p1 = scmp.ne.s32.totalorder (!%p1924_p8), %s1911_s27, 0 }
  0xa8   : > { %1426 = dma.done.wait (%p1925_p1), %s303_s13, 256  }
  0xa9   : > { %1428 = vsyncadd (%p1925_p1), %s303_s13, 4294967040  ;;  %p1926_p2 = scmp.eq.s32.totalorder %s1615_s25, 0 }
  0xab   : > { %1430 = dma.done.wait (%p1926_p2), [#allocation7], 2048   ;;  %p1927_p12 = pmov %p1926_p2 }
  0xac   : > { %s319_s14 = scalar_lea.vmem [#allocation8], %s1782_s17 }
  0xad   : > { %1432 = vsyncadd (%p1927_p12), [#allocation7], 4294965248 }
  0xae   : > { %1434 = dma.done.wait (%p1925_p1), %s303_s13, 512  }
  0xaf   : > { %1436 = vsyncadd (%p1925_p1), %s303_s13, 4294966784  ;;  %s328_s29 = scalar_lea.vmem [#allocation9], %s1782_s17  ;;  %p1928_p13 = pmov %p1926_p2 }
  0xb0   : > { %p1929_p0 = pmov %p1926_p2 }
  0xb1   : > { %1438 = dma.done.wait (%p1928_p13), [#allocation7], 4096  }
  0xb2   : > { %1440 = vsyncadd (%p1929_p0), [#allocation7], 4294963200  ;;  %v384_v0 = vld [vmem:[#allocation6] sm:$0xff]  ;;  %v385_v1 = vld [vmem:[#allocation6 + $0x8] sm:$0xff]  ;;  %s368_s25 = scalar_lea.vmem [#allocation11], %s1782_s17  ;;  %s872_s24 = sshll.u32 %s1459_s21, 8 }
  0xb3   : > { %v386_v2 = vld [vmem:[#allocation6 + $0x10] sm:$0xff]  ;;  %v1032_v3 = vpack.c.bf16 %v385_v1, %v384_v0  ;;  %v387_v4 = vld [vmem:[#allocation6 + $0x18] sm:$0xff]  ;;  %v388_v6 = vld [vmem:[#allocation6 + $0x20] sm:$0xff]  ;;  %s698_s27 = sshll.u32 %s368_s25, 4  ;;  %s1824_s26 = scalar_lea.hbm %s1881_s5, %s872_s24  ;;  %s1826_s27 = int_to_ptr.vmem [resolvable:$true] %s698_s27 }
  0xb4   : > { %v1036_v5 = vpack.c.bf16 %v387_v4, %v386_v2  ;;  %v389_v7 = vld [vmem:[#allocation6 + $0x28] sm:$0xff]  ;;  %v390_v9 = vld [vmem:[#allocation6 + $0x30] sm:$0xff]  ;;  %v391_v10 = vld [vmem:[#allocation6 + $0x38] sm:$0xff]  ;;  %s1830_s21 = scalar_lea.sflag [#allocation5], %s304_s20  ;;  %s1373_s28 = scalar_lea.vmem %s1826_s27, 256 }
  0xb5   : > { %1033 = vmatprep.subr.bf16.mxu0 %v1032_v3  ;;  %v1040_v8 = vpack.c.bf16 %v389_v7, %v388_v6  ;;  %v382_v11 = vld [vmem:[%s306_s0] sm:$0xff]  ;;  %v503_v13 = vld [vmem:[#allocation10 + $0x88] sm:$0xff]  ;;  %v505_v16 = vld [vmem:[#allocation10 + $0x98] sm:$0xff]  ;;  %v1044_v20 = vpack.c.bf16 %v391_v10, %v390_v9  ;;  %p1374_p4 = scmp.ne.s32.totalorder %s1826_s27, %s1373_s28  ;;  %p1930_p9 = scmp.ne.s32.totalorder %s1913_s10, 0 }
  0xb6   : > { %1035 = vmatpush3.bf16.msra.mxu0 %v1032_v3  ;;  %959 = vmatprep.mubr.f32.mxu0 %v382_v11  ;;  %v502_v12 = vld [vmem:[#allocation10 + $0x80] sm:$0xff]  ;;  %v504_v14 = vld [vmem:[#allocation10 + $0x90] sm:$0xff]  ;;  %v507_v19 = vld [vmem:[#allocation10 + $0xa8] sm:$0xff]  ;;  %s1476_s15 = smov [#allocation11]  }
  0xb7   : > { %1037 = vmatprep.subr.bf16.mxu0 %v1036_v5  ;;  %v1064_v15 = vpack.c.bf16 %v503_v13, %v502_v12  ;;  %v1068_v17 = vpack.c.bf16 %v505_v16, %v504_v14  ;;  %v506_v18 = vld [vmem:[#allocation10 + $0xa0] sm:$0xff]  ;;  %v393_v22 = vld [vmem:[#allocation6 + $0x48] sm:$0xff]  ;;  %v508_v25 = vld [vmem:[#allocation10 + $0xb0] sm:$0xff]  ;;  %p1375_p10 = pnand %p1374_p4, %p1930_p9  ;;  %s1377_s9 = sshll.u32 %s1476_s15, 4  ;;  %s1378_s9 = int_to_ptr.vmem [resolvable:$false] %s1377_s9 }
  0xb8   : > { %v392_v21 = vld [vmem:[#allocation6 + $0x40] sm:$0xff]  ;;  %v1072_v23 = vpack.c.bf16 %v507_v19, %v506_v18  ;;  %v509_v26 = vld [vmem:[#allocation10 + $0xb8] sm:$0xff]  ;;  %v394_v28 = vld [vmem:[#allocation6 + $0x50] sm:$0xff]  ;;  %s1379_s11 = scalar_lea.vmem %s1378_s9, 512  ;;  %p1380_p6 = scmp.lt.s32.totalorder %s1826_s27, %s1378_s9 }
  0xb9   : > { %1065 = vmatprep.subr.bf16.mxu1 %v1064_v15  ;;  %v1807_v24 = vld [vmem:[%s328_s29] sm:$0xff]  ;;  %v1048_v27 = vpack.c.bf16 %v393_v22, %v392_v21  ;;  %v395_v29 = vld [vmem:[#allocation6 + $0x58] sm:$0xff]  ;;  %v1076_v30 = vpack.c.bf16 %v509_v26, %v508_v25  ;;  %v511_v32 = vld [vmem:[#allocation10 + $0xc8] sm:$0xff]  ;;  %p1376_p7 = pneg %p1375_p10  ;;  %p1381_p5 = scmp.lt.s32.totalorder %s1379_s11, %s1373_s28 }
  0xba   : > { %1039 = vmatpush3.bf16.msra.mxu0 %v1036_v5  ;;  %1067 = vmatpush3.bf16.msra.mxu1 %v1064_v15  ;;  %v510_v31 = vld [vmem:[#allocation10 + $0xc0] sm:$0xff]  ;;  %v1052_v33 = vpack.c.bf16 %v395_v29, %v394_v28  ;;  %v397_v35 = vld [vmem:[#allocation6 + $0x68] sm:$0xff]  ;;  %v512_v37 = vld [vmem:[#allocation10 + $0xd0] sm:$0xff]  ;;  %v674_v19 = vmul.f32 0.059453487, %v1807_v24 }
  0xbb   : > { %1041 = vmatprep.subr.bf16.mxu0 %v1040_v8  ;;  %1069 = vmatprep.subr.bf16.mxu1 %v1068_v17  ;;  %v396_v34 = vld [vmem:[#allocation6 + $0x60] sm:$0xff]  ;;  %v1080_v36 = vpack.c.bf16 %v511_v32, %v510_v31  ;;  %v513_v38 = vld [vmem:[#allocation10 + $0xd8] sm:$0xff]  ;;  %v398_v40 = vld [vmem:[#allocation6 + $0x70] sm:$0xff]  ;;  %p1382_p3 = por %p1381_p5, %p1380_p6 }
  0xbc   : > { %994 = vmatprep.mubr.f32.mxu1 %v1807_v24  ;;  %v1056_v39 = vpack.c.bf16 %v397_v35, %v396_v34  ;;  %v399_v41 = vld [vmem:[#allocation6 + $0x78] sm:$0xff]  ;;  %v1084_v42 = vpack.c.bf16 %v513_v38, %v512_v37  ;;  %v514_v43 = vld [vmem:[#allocation10 + $0xe0] sm:$0xff]  ;;  %v515_v44 = vld [vmem:[#allocation10 + $0xe8] sm:$0xff] }
  0xbd   : > { %v1060_v45 = vpack.c.bf16 %v399_v41, %v398_v40  ;;  %v1088_v46 = vpack.c.bf16 %v515_v44, %v514_v43  ;;  %v516_v47 = vld [vmem:[#allocation10 + $0xf0] sm:$0xff]  ;;  %v517_v48 = vld [vmem:[#allocation10 + $0xf8] sm:$0xff]  ;;  %v486_v51 = vld [vmem:[#allocation10] sm:$0xff]  ;;  %p1383_p11 = pnand %p1382_p3, %p1376_p7 }
  0xbe   : > { %1043 = vmatpush3.bf16.msra.mxu0 %v1040_v8  ;;  %1071 = vmatpush3.bf16.msra.mxu1 %v1068_v17  ;;  %v1092_v49 = vpack.c.bf16 %v517_v48, %v516_v47  ;;  %v383_v50 = vld [vmem:[%s306_s0 + $0x8] sm:$0xff]  ;;  %v488_v54 = vld [vmem:[#allocation10 + $0x10] sm:$0xff]  ;;  %v490_v58 = vld [vmem:[#allocation10 + $0x20] sm:$0xff] }
  0xbf   : > { %1045 = vmatprep.subr.bf16.mxu0 %v1044_v20  ;;  %1073 = vmatprep.subr.bf16.mxu1 %v1072_v23  ;;  %v487_v52 = vld [vmem:[#allocation10 + $0x8] sm:$0xff]  ;;  %v489_v55 = vld [vmem:[#allocation10 + $0x18] sm:$0xff]  ;;  %v492_v61 = vld [vmem:[#allocation10 + $0x30] sm:$0xff] }
  0xc0   : > { %v1096_v53 = vpack.c.bf16 %v487_v52, %v486_v51  ;;  %v485_v56 = vld [vmem:[%s328_s29 + $0x8] sm:$0xff]  ;;  %v1100_v57 = vpack.c.bf16 %v489_v55, %v488_v54  ;;  %v494_v0 = vld [vmem:[#allocation10 + $0x40] sm:$0xff]  ;;  %v496_v3 = vld [vmem:[#allocation10 + $0x50] sm:$0xff] }
  0xc1   : > { %v491_v59 = vld [vmem:[#allocation10 + $0x28] sm:$0xff]  ;;  %v493_v62 = vld [vmem:[#allocation10 + $0x38] sm:$0xff]  ;;  %v498_v6 = vld [vmem:[#allocation10 + $0x60] sm:$0xff]  ;;  %v675_v14 = vmul.f32 0.059453487, %v485_v56 }
  0xc2   : > { %1047 = vmatpush3.bf16.msra.mxu0 %v1044_v20  ;;  %1075 = vmatpush3.bf16.msra.mxu1 %v1072_v23  ;;  %v1104_v60 = vpack.c.bf16 %v491_v59, %v490_v58  ;;  %v1108_v63 = vpack.c.bf16 %v493_v62, %v492_v61  ;;  %v495_v1 = vld [vmem:[#allocation10 + $0x48] sm:$0xff]  ;;  %v497_v4 = vld [vmem:[#allocation10 + $0x58] sm:$0xff]  ;;  %v500_v9 = vld [vmem:[#allocation10 + $0x70] sm:$0xff] }
  0xc3   : > { %1049 = vmatprep.subr.bf16.mxu0 %v1048_v27  ;;  %1077 = vmatprep.subr.bf16.mxu1 %v1076_v30  ;;  %v1112_v2 = vpack.c.bf16 %v495_v1, %v494_v0  ;;  %v1116_v5 = vpack.c.bf16 %v497_v4, %v496_v3  ;;  %v499_v7 = vld [vmem:[#allocation10 + $0x68] sm:$0xff]  ;;  %v501_v10 = vld [vmem:[#allocation10 + $0x78] sm:$0xff] }
  0xc4   : > { %v1120_v8 = vpack.c.bf16 %v499_v7, %v498_v6  ;;  %v1124_v11 = vpack.c.bf16 %v501_v10, %v500_v9  ;;  %v679_v23 = vld [vmem:[%s319_s14 + $0x8] sm:$0xff] }
  0xc6   : > { %1051 = vmatpush3.bf16.msra.mxu0 %v1048_v27  ;;  %1079 = vmatpush3.bf16.msra.mxu1 %v1076_v30  ;;  %v678_v27 = vld [vmem:[%s319_s14] sm:$0xff] }
  0xc7   : > { %1053 = vmatprep.subr.bf16.mxu0 %v1052_v33  ;;  %1081 = vmatprep.subr.bf16.mxu1 %v1080_v36 }
  0xca   : > { %1055 = vmatpush3.bf16.msra.mxu0 %v1052_v33  ;;  %1083 = vmatpush3.bf16.msra.mxu1 %v1080_v36 }
  0xcb   : > { %1057 = vmatprep.subr.bf16.mxu0 %v1056_v39  ;;  %1085 = vmatprep.subr.bf16.mxu1 %v1084_v42 }
  0xce   : > { %1059 = vmatpush3.bf16.msra.mxu0 %v1056_v39  ;;  %1087 = vmatpush3.bf16.msra.mxu1 %v1084_v42 }
  0xcf   : > { %1061 = vmatprep.subr.bf16.mxu0 %v1060_v45  ;;  %1089 = vmatprep.subr.bf16.mxu1 %v1088_v46 }
  0xd2   : > { %1063 = vmatpush3.bf16.msra.mxu0 %v1060_v45  ;;  %1091 = vmatpush3.bf16.msra.mxu1 %v1088_v46 }
  0xd3   : > { %1093 = vmatprep.subr.bf16.mxu1 %v1092_v49 }
  0xd5   : > { %960 = vmatmul.mubr.f32.vlgmr.msra.gmra.mrb[0].mxu0 %v383_v50 }
  0xd6   : > { %1095 = vmatpush3.bf16.msra.mxu1 %v1092_v49 }
  0xd7   : > { %1097 = vmatprep.subr.bf16.mxu1 %v1096_v53 }
  0xd9   : > { %995 = vmatmul.mubr.f32.vlgmr.msra.gmra.mrb[0].mxu1 %v485_v56 }
  0xda   : > { %1099 = vmatpush3.bf16.msra.mxu1 %v1096_v53 }
  0xdb   : > { %1101 = vmatprep.subr.bf16.mxu1 %v1100_v57 }
  0xde   : > { %1103 = vmatpush3.bf16.msra.mxu1 %v1100_v57 }
  0xdf   : > { %1105 = vmatprep.subr.bf16.mxu1 %v1104_v60 }
  0xe2   : > { %1107 = vmatpush3.bf16.msra.mxu1 %v1104_v60 }
  0xe3   : > { %1109 = vmatprep.subr.bf16.mxu1 %v1108_v63 }
  0xe6   : > { %1111 = vmatpush3.bf16.msra.mxu1 %v1108_v63 }
  0xe7   : > { %1113 = vmatprep.subr.bf16.mxu1 %v1112_v2 }
  0xea   : > { %1115 = vmatpush3.bf16.msra.mxu1 %v1112_v2 }
  0xeb   : > { %1117 = vmatprep.subr.bf16.mxu1 %v1116_v5 }
  0xee   : > { %1119 = vmatpush3.bf16.msra.mxu1 %v1116_v5 }
  0xef   : > { %1121 = vmatprep.subr.bf16.mxu1 %v1120_v8 }
  0xf2   : > { %1123 = vmatpush3.bf16.msra.mxu1 %v1120_v8 }
  0xf3   : > { %1125 = vmatprep.subr.bf16.mxu1 %v1124_v11 }
  0xf6   : > { %1127 = vmatpush3.bf16.msra.mxu1 %v1124_v11 }
 0x1a8   : > { %v961_v12 = vpop.f32.mrb[0].mxu0 }
 0x1a9   : > { %v466_v13 = vpop.f32.mrb[1].mxu0  ;;  %v671_v16 = vmul.f32 0.5350814, %v961_v12 }
 0x1aa   : > { %1029 = vmatprep.mubr.f32.mxu1 %v466_v13  ;;  %v670_v20 = vmul.f32 0.5350814, %v466_v13 }
 0x1ab   : > { %1030 = vmatmul.mubr.f32.vlgmr.msra.gmra.mrb[0].mxu1 %v961_v12 }
 0x27e   : > { %v1031_v15 = vpop.f32.mrb[0].mxu1 }
 0x27f   : > { %v669_v17 = vmul.f32 0.4054651, %v1031_v15  ;;  %v659_v18 = vpop.f32.mrb[1].mxu1 }
 0x280   : > { %v668_v21 = vmul.f32 0.4054651, %v659_v18 }
 0x281   : > { %v673_v22 = vadd.f32 %v671_v16, %v669_v17 }
 0x282   : > { %v672_v25 = vadd.f32 %v670_v20, %v668_v21 }
 0x283   : > { %v677_v26 = vadd.f32 %v675_v14, %v673_v22 }
 0x284   : > { %v676_v28 = vadd.f32 %v674_v19, %v672_v25 }
 0x285   : > { %v681_v29 = vadd.f32 %v679_v23, %v677_v26 }
 0x286   : > { %v680_v24 = vadd.f32 %v678_v27, %v676_v28 }
 0x287   : > { %683 = vst [vmem:[%s368_s25 + $0x8] sm:$0xff] %v681_v29 }
 0x288   : > { %682 = vst [vmem:[%s368_s25] sm:$0xff] %v680_v24 }
 0x289   : > { %1386 = shalt.err (!%p1383_p11)
}
 0x28a   : > { %s1387_s22 = scalar_lea.hbm %s1824_s26, 256  ;;  %s1391_s8 = scalar_lea.hbm %s1881_s5, 2048 }
 0x28b   : > { %p1388_p8 = scmp.ne.s32.totalorder %s1824_s26, %s1387_s22  ;;  %p1392_p12 = scmp.lt.u32.totalorder %s1824_s26, %s1881_s5 }
 0x28c   : > { %p1393_p13 = scmp.lt.u32.totalorder %s1391_s8, %s1387_s22  ;;  %p1395_p4 = scmp.lt.u32.totalorder %s1387_s22, %s1824_s26 }
 0x28d   : > { %p1389_p1 = pnand %p1388_p8, %p1930_p9 }
 0x28e   : > { %p1394_p0 = por %p1393_p13, %p1392_p12 }
 0x28f   : > { %p1390_p2 = pneg %p1389_p1 }
 0x290   : > { %p1396_p10 = por %p1395_p4, %p1394_p0 }
 0x292   : > { %p1397_p7 = pnand %p1396_p10, %p1390_p2 }
 0x294   : > { %1400 = shalt.err (!%p1397_p7)
}
 0x295   : > { %s1477_s16 = smov 128   ;;  %s1478_s20 = smov 8  }
 0x296   : > { %1144 = dma.vmem_to_hbm [thread:$0]  (%p1930_p9), %s1826_s27, 256, %s1824_s26, %s1830_s21, %s1477_s16, %s1477_s16, %s1478_s20  }
 0x297 PF: > { %s1931_s17 = sld [smem:[#allocation17_spill]]  ;;  %s1932_s13 = sld [smem:[#allocation22_spill]] }
 0x298   : > { %p1172_p6 = scmp.ge.s32.totalorder %s1467_s23, 2 }
 0x29d   : > { %s713_s0 = sand.u32 1, %s1931_s17   ;;  %p1933_p5 = scmp.ne.s32.totalorder %s1932_s13, 0 }
 0x29e   : > { %s714_s14 = scalar_lea.sflag [#allocation5], %s713_s0 }
 0x29f   : > { %p1164_p3 = pnand %p1172_p6, %p1933_p5 }
 0x2a1   : > { %1442 = dma.done.wait (!%p1164_p3), %s714_s14, 256  }
 0x2a2   : > { %1444 = vsyncadd (!%p1164_p3), %s714_s14, 4294967040  ;;  %s22_s23 = sadd.s32 1, %s1467_s23   ;;  %s1934_s29 = sld [smem:[#allocation18_spill]] }
 0x2a3   : > { %p19_p11 = scmp.ge.s32.totalorder %s22_s23, 10   ;;  %s1935_s20 = sld [smem:[#allocation21_spill]] }
 0x2a4   : > { %s1936_s21 = sld [smem:[#allocation19_spill]]  ;;  %s1937_s22 = sld [smem:[#allocation20_spill]] }
 0x2a5   : > { %s1938_s18 = smov %s1451_s19  ;;  %21 = sbr.rel (!%p19_p11) target bundleno = 10 (0xa), region = 124 }
 0x2a8   : > { %s1939_s19 = smov %s1934_s29 }
 0x2ac   :  { %719 = vsyncpa [#allocation4], 1 }
 0x2ad   :  { %721 = vsyncpa [#allocation4 + $0x1], 1 }
 0x2ae   :  { %722 = vsyncpa [#allocation7], 1 }
 0x2af   :  { %723 = vsyncpa [#allocation5], 1 }
 0x2b0   :  { %725 = vsyncpa [#allocation5 + $0x1], 1 }

</bundles_post_ra>
